<compile_context>
chip_gen: v7x
topology: tpu7x:2x2x1
jax: 0.10.0
libtpu: 0.0.40
codegen_flags: <defaults>
</compile_context>

<pallas_src>
import jax
import jax.numpy as jnp
from jax.experimental import pallas as pl
from jax.experimental.pallas import tpu as pltpu

# ----------------------------- model sizes ---------------------------------
B = 2            # batch
S = 8            # sequence length (graph nodes)
H = 32           # bert.hidden
VOCAB = 100
N_SEG = 4
N_TOPICS = 5
N_STAGES = 6

PAD_B = 8        # batch rows padded to one full sublane group
LANES = 128      # lane-dense output slab width

# per-branch output slab column layout: [graph_vec | reconstructed | topic | stage | padding]
COL_GRAPH = 0
COL_REC = 32
COL_TOPIC = 64
COL_STAGE = 96


# --------------------------- fused Pallas kernel ----------------------------
def _vae_fused_kernel(ids_ref, seg_ref, adj_ref,
                      tok_ref, sege_ref, wg_ref, bg_ref,
                      wd_ref, bd_ref, wr_ref, ws_ref, bs_ref,
                      out_ref):
    """One grid step == one branch (0 = positive [+ VAE head], 1 = negative).

    ids/seg: (B*S, 1) i32   adj: (B, S, S) f32
    tok: (VOCAB, H)  sege: (N_SEG, H)  wg: (H, H)  bg: (1, H)
    wd: (H, T)  bd: (1, T)  wr: (T, H)  ws: (T, 6)  bs: (1, 6)
    out: (PAD_B, LANES) f32 lane-dense slab
    """
    f32 = jnp.float32

    # ---- embedding lookup fused in-kernel (one-hot @ table) ----
    ids = ids_ref[...]                                            # (B*S, 1) i32
    segs = seg_ref[...]                                           # (B*S, 1) i32
    tok_oh = (ids == jax.lax.broadcasted_iota(jnp.int32, (B * S, VOCAB), 1)).astype(f32)
    seg_oh = (segs == jax.lax.broadcasted_iota(jnp.int32, (B * S, N_SEG), 1)).astype(f32)
    emb = (jnp.dot(tok_oh, tok_ref[...], preferred_element_type=f32)
           + jnp.dot(seg_oh, sege_ref[...], preferred_element_type=f32))   # (B*S, H)
    emb3 = emb.reshape(B, S, H)

    # ---- stand-in BERTGraph: adjacency aggregation + (folded) mean pool + linear + tanh ----
    # mean_i(adj @ emb) == (mean_i adj) @ emb  -> fold the pool into the adjacency.
    a = jnp.mean(adj_ref[...], axis=1, keepdims=True)             # (B, 1, S)
    pooled = jnp.einsum("bis,bsh->bih", a, emb3,
                        preferred_element_type=f32)[:, 0, :]      # (B, H)
    # pad batch/sublane dim to 8 so downstream matmuls / stores are unmasked
    pooled8 = jnp.concatenate(
        [pooled, jnp.zeros((PAD_B - B, H), f32)], axis=0)         # (8, H)
    graph8 = jnp.tanh(
        jnp.dot(pooled8, wg_ref[...], preferred_element_type=f32) + bg_ref[...])  # (8, H)

    # lane-dense output slab: graph_vec in cols [0, 32), remainder zero-initialised
    out_ref[...] = jnp.concatenate(
        [graph8, jnp.zeros((PAD_B, LANES - H), f32)], axis=1)

    # ---- VAE head: only on the positive branch (grid step 0) ----
    @pl.when(pl.program_id(0) == 0)
    def _():
        # dim_reduction
        logits = jnp.dot(graph8, wd_ref[...], preferred_element_type=f32) + bd_ref[...]  # (8, T)
        # spv_stage_label uses PRE-softmax logits, exactly as in the PyTorch module
        stage = jnp.dot(logits, ws_ref[...], preferred_element_type=f32) + bs_ref[...]   # (8, 6)
        # Softmax(dim=1)
        m = jnp.max(logits, axis=-1, keepdims=True)
        e = jnp.exp(logits - m)
        p = e / jnp.sum(e, axis=-1, keepdims=True)                                        # (8, T)
        # reconstruction (bias=False)
        rec = jnp.dot(p, wr_ref[...], preferred_element_type=f32)                         # (8, H)
        out_ref[:, COL_REC:COL_REC + H] = rec
        out_ref[:, COL_TOPIC:COL_TOPIC + N_TOPICS] = p
        out_ref[:, COL_STAGE:COL_STAGE + N_STAGES] = stage


# ----------------------------- wrapper --------------------------------------
def vae_forward(params, x, neg_x, segment_label, neg_segment_label,
                adj_mat, neg_adj_mat, train=True):
    del train  # stand-in encoder is deterministic

    ids = jnp.stack([x, neg_x]).reshape(2, B * S, 1)                       # (2, B*S, 1) i32
    segs = jnp.stack([segment_label, neg_segment_label]).reshape(2, B * S, 1)
    adjs = jnp.stack([adj_mat, neg_adj_mat])                               # (2, B, S, S)

    const2 = lambda i: (0, 0)   # weights: fetched once, resident across both grid steps
    slab = pl.pallas_call(
        _vae_fused_kernel,
        out_shape=jax.ShapeDtypeStruct((2, PAD_B, LANES), jnp.float32),
        grid=(2,),
        in_specs=[
            pl.BlockSpec((None, B * S, 1), lambda i: (i, 0, 0)),    # token ids (pos/neg)
            pl.BlockSpec((None, B * S, 1), lambda i: (i, 0, 0)),    # segment labels
            pl.BlockSpec((None, B, S, S), lambda i: (i, 0, 0, 0)),  # adjacency
            pl.BlockSpec((VOCAB, H), const2),                       # token embedding table
            pl.BlockSpec((N_SEG, H), const2),                       # segment embedding table
            pl.BlockSpec((H, H), const2),                           # wg
            pl.BlockSpec((1, H), const2),                           # bg
            pl.BlockSpec((H, N_TOPICS), const2),                    # wd (dim_reduction)
            pl.BlockSpec((1, N_TOPICS), const2),                    # bd
            pl.BlockSpec((N_TOPICS, H), const2),                    # wr (reconstruction)
            pl.BlockSpec((N_TOPICS, N_STAGES), const2),             # ws (spv_stage_label)
            pl.BlockSpec((1, N_STAGES), const2),                    # bs
        ],
        out_specs=pl.BlockSpec((None, PAD_B, LANES), lambda i: (i, 0, 0)),
        compiler_params=pltpu.CompilerParams(
            dimension_semantics=("parallel",)),   # pos/neg shard across TCs on v7x
    )(ids, segs, adjs,
      params["tok_emb"], params["seg_emb"], params["wg"], params["bg"],
      params["wd"], params["bd"], params["wr"], params["ws"], params["bs"])

    graph_vec = slab[0, :B, COL_GRAPH:COL_GRAPH + H]
    neg_graph_vec = slab[1, :B, COL_GRAPH:COL_GRAPH + H]
    reconstructed_vec = slab[0, :B, COL_REC:COL_REC + H]
    topic_dist = slab[0, :B, COL_TOPIC:COL_TOPIC + N_TOPICS]
    stage_vec = slab[0, :B, COL_STAGE:COL_STAGE + N_STAGES]
    return reconstructed_vec, graph_vec, neg_graph_vec, topic_dist, stage_vec


# ------------------------- deterministic params ------------------------------
def init_params(key):
    ks = jax.random.split(key, 8)
    scale = 0.02
    return {
        # stand-in BERTGraph encoder
        "tok_emb": scale * jax.random.normal(ks[0], (VOCAB, H), jnp.float32),
        "seg_emb": scale * jax.random.normal(ks[1], (N_SEG, H), jnp.float32),
        "wg": scale * jax.random.normal(ks[2], (H, H), jnp.float32),
        "bg": jnp.zeros((1, H), jnp.float32),
        # dim_reduction: Linear(H, n_topics)   (stored as (in, out))
        "wd": scale * jax.random.normal(ks[3], (H, N_TOPICS), jnp.float32),
        "bd": scale * jax.random.normal(ks[4], (1, N_TOPICS), jnp.float32),
        # reconstruction: Linear(n_topics, H, bias=False)
        "wr": scale * jax.random.normal(ks[5], (N_TOPICS, H), jnp.float32),
        # spv_stage_label: Linear(n_topics, 6)
        "ws": scale * jax.random.normal(ks[6], (N_TOPICS, N_STAGES), jnp.float32),
        "bs": scale * jax.random.normal(ks[7], (1, N_STAGES), jnp.float32),
    }


def vae_reference(params, x, neg_x, segment_label, neg_segment_label, adj_mat, neg_adj_mat):
    """Pure-JAX reference with the original (unfolded) mean-pool ordering."""
    def encode(ids, segl, adj):
        emb = params["tok_emb"][ids] + params["seg_emb"][segl]          # (B, S, H)
        h = jnp.einsum("bij,bjh->bih", adj, emb)
        pooled = jnp.mean(h, axis=1)
        return jnp.tanh(pooled @ params["wg"] + params["bg"])
    g = encode(x, segment_label, adj_mat)
    ng = encode(neg_x, neg_segment_label, neg_adj_mat)
    logits = g @ params["wd"] + params["bd"]
    stage = logits @ params["ws"] + params["bs"]
    topic = jax.nn.softmax(logits, axis=1)
    rec = topic @ params["wr"]
    return rec, g, ng, topic, stage


if __name__ == "__main__":
    key = jax.random.PRNGKey(0)
    kp, k1, k2, k3, k4, k5, k6 = jax.random.split(key, 7)
    params = init_params(kp)

    x = jax.random.randint(k1, (B, S), 0, VOCAB, dtype=jnp.int32)
    neg_x = jax.random.randint(k2, (B, S), 0, VOCAB, dtype=jnp.int32)
    segment_label = jax.random.randint(k3, (B, S), 0, N_SEG, dtype=jnp.int32)
    neg_segment_label = jax.random.randint(k4, (B, S), 0, N_SEG, dtype=jnp.int32)
    adj_mat = jax.random.uniform(k5, (B, S, S), jnp.float32)
    neg_adj_mat = jax.random.uniform(k6, (B, S, S), jnp.float32)

    outs = jax.jit(vae_forward)(params, x, neg_x, segment_label,
                                neg_segment_label, adj_mat, neg_adj_mat)
    outs = jax.block_until_ready(outs)
    reconstructed_vec, graph_vec, neg_graph_vec, topic_dist, stage_vec = outs

    assert reconstructed_vec.shape == (B, H)
    assert graph_vec.shape == (B, H)
    assert neg_graph_vec.shape == (B, H)
    assert topic_dist.shape == (B, N_TOPICS)
    assert stage_vec.shape == (B, N_STAGES)
    assert bool(jnp.all(jnp.isfinite(jnp.concatenate(
        [reconstructed_vec, graph_vec, neg_graph_vec], axis=1))))
    # softmax rows sum to 1
    assert jnp.allclose(jnp.sum(topic_dist, axis=1), 1.0, atol=1e-5)

    # sanity check vs. pure-JAX reference (loose tolerance: the kernel folds the mean-pool
    # and runs f32 matmuls through the MXU, so bit-exactness is not expected)
    refs = vae_reference(params, x, neg_x, segment_label, neg_segment_label,
                         adj_mat, neg_adj_mat)
    names = ["reconstructed_vec", "graph_vec", "neg_graph_vec", "topic_dist", "stage_vec"]
    for name, got, ref in zip(names, outs, refs):
        scale_ = float(jnp.maximum(jnp.max(jnp.abs(ref)), 1e-6))
        err = float(jnp.max(jnp.abs(got - ref))) / scale_
        assert err < 0.1, f"{name}: relative-to-max error {err:.3e}"

    print("KERNEL_OK")
</pallas_src>

<mosaic_0001>
module attributes {stable_mosaic.version = 11 : i64} {
  func.func @_vae_fused_kernel(%arg0: i32, %arg1: memref<1x16x1xi32, #tpu.memory_space<vmem>>, %arg2: memref<1x16x1xi32, #tpu.memory_space<vmem>>, %arg3: memref<1x2x8x8xf32, #tpu.memory_space<vmem>>, %arg4: memref<100x32xf32, #tpu.memory_space<vmem>>, %arg5: memref<4x32xf32, #tpu.memory_space<vmem>>, %arg6: memref<32x32xf32, #tpu.memory_space<vmem>>, %arg7: memref<1x32xf32, #tpu.memory_space<vmem>>, %arg8: memref<32x5xf32, #tpu.memory_space<vmem>>, %arg9: memref<1x5xf32, #tpu.memory_space<vmem>>, %arg10: memref<5x32xf32, #tpu.memory_space<vmem>>, %arg11: memref<5x6xf32, #tpu.memory_space<vmem>>, %arg12: memref<1x6xf32, #tpu.memory_space<vmem>>, %arg13: memref<1x8x128xf32, #tpu.memory_space<vmem>>) attributes {dimension_semantics = [#tpu.dimension_semantics<parallel>], iteration_bounds = array<i64: 2>, scalar_prefetch = 0 : i64, scratch_operands = 0 : i64, tpu.core_type = #tpu.core_type<tc>, window_params = [{transform_indices = @transform_0, window_bounds = array<i64: 1, 16, 1>}, {transform_indices = @transform_1, window_bounds = array<i64: 1, 16, 1>}, {transform_indices = @transform_2, window_bounds = array<i64: 1, 2, 8, 8>}, {pipeline_mode = #tpu.pipeline_mode<synchronous>, transform_indices = @transform_3, window_bounds = array<i64: 100, 32>}, {pipeline_mode = #tpu.pipeline_mode<synchronous>, transform_indices = @transform_4, window_bounds = array<i64: 4, 32>}, {pipeline_mode = #tpu.pipeline_mode<synchronous>, transform_indices = @transform_5, window_bounds = array<i64: 32, 32>}, {pipeline_mode = #tpu.pipeline_mode<synchronous>, transform_indices = @transform_6, window_bounds = array<i64: 1, 32>}, {pipeline_mode = #tpu.pipeline_mode<synchronous>, transform_indices = @transform_7, window_bounds = array<i64: 32, 5>}, {pipeline_mode = #tpu.pipeline_mode<synchronous>, transform_indices = @transform_8, window_bounds = array<i64: 1, 5>}, {pipeline_mode = #tpu.pipeline_mode<synchronous>, transform_indices = @transform_9, window_bounds = array<i64: 5, 32>}, {pipeline_mode = #tpu.pipeline_mode<synchronous>, transform_indices = @transform_10, window_bounds = array<i64: 5, 6>}, {pipeline_mode = #tpu.pipeline_mode<synchronous>, transform_indices = @transform_11, window_bounds = array<i64: 1, 6>}, {transform_indices = @transform_12, window_bounds = array<i64: 1, 8, 128>}]} {
    %c0 = arith.constant 0 : index
    %c0_0 = arith.constant 0 : index
    %c0_1 = arith.constant 0 : index
    %0 = vector.load %arg1[%c0, %c0_0, %c0_1] : memref<1x16x1xi32, #tpu.memory_space<vmem>>, vector<1x16x1xi32>
    %1 = vector.shape_cast %0 : vector<1x16x1xi32> to vector<16x1xi32>
    %c0_2 = arith.constant 0 : index
    %c0_3 = arith.constant 0 : index
    %c0_4 = arith.constant 0 : index
    %2 = vector.load %arg2[%c0_2, %c0_3, %c0_4] : memref<1x16x1xi32, #tpu.memory_space<vmem>>, vector<1x16x1xi32>
    %3 = vector.shape_cast %2 : vector<1x16x1xi32> to vector<16x1xi32>
    %4 = tpu.iota {dimensions = array<i32: 1>} : vector<16x100xi32>
    %5 = vector.broadcast %1 : vector<16x1xi32> to vector<16x100xi32>
    %6 = arith.cmpi eq, %5, %4 : vector<16x100xi32>
    %7 = arith.extui %6 : vector<16x100xi1> to vector<16x100xi32>
    %8 = arith.sitofp %7 : vector<16x100xi32> to vector<16x100xf32>
    %9 = tpu.iota {dimensions = array<i32: 1>} : vector<16x4xi32>
    %10 = vector.broadcast %3 : vector<16x1xi32> to vector<16x4xi32>
    %11 = arith.cmpi eq, %10, %9 : vector<16x4xi32>
    %12 = arith.extui %11 : vector<16x4xi1> to vector<16x4xi32>
    %13 = arith.sitofp %12 : vector<16x4xi32> to vector<16x4xf32>
    %c0_5 = arith.constant 0 : index
    %c0_6 = arith.constant 0 : index
    %14 = vector.load %arg4[%c0_5, %c0_6] : memref<100x32xf32, #tpu.memory_space<vmem>>, vector<100x32xf32>
    %cst = arith.constant dense<0.000000e+00> : vector<16x32xf32>
    %15 = tpu.matmul %8, %14, %cst {dimension_numbers = #tpu.dot_dimension_numbers<[1], [0], [0], [1], [0, 0, 1, 1], [], []>} : vector<16x100xf32>, vector<100x32xf32>, vector<16x32xf32> -> vector<16x32xf32>
    %c0_7 = arith.constant 0 : index
    %c0_8 = arith.constant 0 : index
    %16 = vector.load %arg5[%c0_7, %c0_8] : memref<4x32xf32, #tpu.memory_space<vmem>>, vector<4x32xf32>
    %cst_9 = arith.constant dense<0.000000e+00> : vector<16x32xf32>
    %17 = tpu.matmul %13, %16, %cst_9 {dimension_numbers = #tpu.dot_dimension_numbers<[1], [0], [0], [1], [0, 0, 1, 1], [], []>} : vector<16x4xf32>, vector<4x32xf32>, vector<16x32xf32> -> vector<16x32xf32>
    %18 = arith.addf %15, %17 : vector<16x32xf32>
    %19 = vector.shape_cast %18 : vector<16x32xf32> to vector<2x8x32xf32>
    %c0_10 = arith.constant 0 : index
    %c0_11 = arith.constant 0 : index
    %c0_12 = arith.constant 0 : index
    %c0_13 = arith.constant 0 : index
    %20 = vector.load %arg3[%c0_10, %c0_11, %c0_12, %c0_13] : memref<1x2x8x8xf32, #tpu.memory_space<vmem>>, vector<1x2x8x8xf32>
    %21 = vector.shape_cast %20 : vector<1x2x8x8xf32> to vector<2x8x8xf32>
    %cst_14 = arith.constant dense<0.000000e+00> : vector<2x8xf32>
    %22 = vector.multi_reduction <add>, %21, %cst_14 [1] : vector<2x8x8xf32> to vector<2x8xf32>
    %23 = vector.shape_cast %22 : vector<2x8xf32> to vector<2x1x8xf32>
    %cst_15 = arith.constant 8.000000e+00 : f32
    %24 = vector.broadcast %cst_15 : f32 to vector<2x1x8xf32>
    %25 = arith.divf %23, %24 : vector<2x1x8xf32>
    "tpu.trace_start"() <{level = 10 : i32, message = "bis,bsh->bih"}> : () -> ()
    %cst_16 = arith.constant dense<0.000000e+00> : vector<2x1x32xf32>
    %26 = tpu.matmul %25, %19, %cst_16 {dimension_numbers = #tpu.dot_dimension_numbers<[2], [1], [1], [2], [0, 0, 0, 1, 1, 2], [0], [0]>} : vector<2x1x8xf32>, vector<2x8x32xf32>, vector<2x1x32xf32> -> vector<2x1x32xf32>
    "tpu.trace_stop"() : () -> ()
    %27 = vector.shape_cast %26 : vector<2x1x32xf32> to vector<2x32xf32>
    %cst_17 = arith.constant 0.000000e+00 : f32
    %28 = vector.broadcast %cst_17 : f32 to vector<6x32xf32>
    %29 = tpu.concatenate %27, %28 in 0 : vector<2x32xf32>, vector<6x32xf32> -> vector<8x32xf32>
    %c0_18 = arith.constant 0 : index
    %c0_19 = arith.constant 0 : index
    %30 = vector.load %arg6[%c0_18, %c0_19] : memref<32x32xf32, #tpu.memory_space<vmem>>, vector<32x32xf32>
    %cst_20 = arith.constant dense<0.000000e+00> : vector<8x32xf32>
    %31 = tpu.matmul %29, %30, %cst_20 {dimension_numbers = #tpu.dot_dimension_numbers<[1], [0], [0], [1], [0, 0, 1, 1], [], []>} : vector<8x32xf32>, vector<32x32xf32>, vector<8x32xf32> -> vector<8x32xf32>
    %c0_21 = arith.constant 0 : index
    %c0_22 = arith.constant 0 : index
    %32 = vector.load %arg7[%c0_21, %c0_22] : memref<1x32xf32, #tpu.memory_space<vmem>>, vector<1x32xf32>
    %33 = vector.broadcast %32 : vector<1x32xf32> to vector<8x32xf32>
    %34 = arith.addf %31, %33 : vector<8x32xf32>
    %35 = math.tanh %34 : vector<8x32xf32>
    %cst_23 = arith.constant 0.000000e+00 : f32
    %36 = vector.broadcast %cst_23 : f32 to vector<8x96xf32>
    %37 = tpu.concatenate %35, %36 in 1 : vector<8x32xf32>, vector<8x96xf32> -> vector<8x128xf32>
    %c0_24 = arith.constant 0 : index
    %c0_25 = arith.constant 0 : index
    %c0_26 = arith.constant 0 : index
    %38 = vector.load %arg13[%c0_24, %c0_25, %c0_26] : memref<1x8x128xf32, #tpu.memory_space<vmem>>, vector<1x8x128xf32>
    %39 = vector.shape_cast %38 : vector<1x8x128xf32> to vector<8x128xf32>
    %40 = vector.shape_cast %37 : vector<8x128xf32> to vector<1x8x128xf32>
    tpu.vector_store %arg13[%c0_24, %c0_25, %c0_26], %40 {strides = array<i32>} : memref<1x8x128xf32, #tpu.memory_space<vmem>>, vector<1x8x128xf32>,
    %c0_i32 = arith.constant 0 : i32
    %41 = arith.cmpi eq, %arg0, %c0_i32 : i32
    %42 = arith.extui %41 : i1 to i32
    %c0_i32_27 = arith.constant 0 : i32
    %43 = arith.cmpi ne, %42, %c0_i32_27 : i32
    scf.if %43 {
      %c0_28 = arith.constant 0 : index
      %c0_29 = arith.constant 0 : index
      %44 = vector.load %arg8[%c0_28, %c0_29] : memref<32x5xf32, #tpu.memory_space<vmem>>, vector<32x5xf32>
      %cst_30 = arith.constant dense<0.000000e+00> : vector<8x5xf32>
      %45 = tpu.matmul %35, %44, %cst_30 {dimension_numbers = #tpu.dot_dimension_numbers<[1], [0], [0], [1], [0, 0, 1, 1], [], []>} : vector<8x32xf32>, vector<32x5xf32>, vector<8x5xf32> -> vector<8x5xf32>
      %c0_31 = arith.constant 0 : index
      %c0_32 = arith.constant 0 : index
      %46 = vector.load %arg9[%c0_31, %c0_32] : memref<1x5xf32, #tpu.memory_space<vmem>>, vector<1x5xf32>
      %47 = vector.broadcast %46 : vector<1x5xf32> to vector<8x5xf32>
      %48 = arith.addf %45, %47 : vector<8x5xf32>
      %c0_33 = arith.constant 0 : index
      %c0_34 = arith.constant 0 : index
      %49 = vector.load %arg11[%c0_33, %c0_34] : memref<5x6xf32, #tpu.memory_space<vmem>>, vector<5x6xf32>
      %cst_35 = arith.constant dense<0.000000e+00> : vector<8x6xf32>
      %50 = tpu.matmul %48, %49, %cst_35 {dimension_numbers = #tpu.dot_dimension_numbers<[1], [0], [0], [1], [0, 0, 1, 1], [], []>} : vector<8x5xf32>, vector<5x6xf32>, vector<8x6xf32> -> vector<8x6xf32>
      %c0_36 = arith.constant 0 : index
      %c0_37 = arith.constant 0 : index
      %51 = vector.load %arg12[%c0_36, %c0_37] : memref<1x6xf32, #tpu.memory_space<vmem>>, vector<1x6xf32>
      %52 = vector.broadcast %51 : vector<1x6xf32> to vector<8x6xf32>
      %53 = arith.addf %50, %52 : vector<8x6xf32>
      %cst_38 = arith.constant dense<0xFF800000> : vector<8xf32>
      %54 = vector.multi_reduction <maximumf>, %48, %cst_38 [1] : vector<8x5xf32> to vector<8xf32>
      %55 = vector.shape_cast %54 : vector<8xf32> to vector<8x1xf32>
      %56 = vector.broadcast %55 : vector<8x1xf32> to vector<8x5xf32>
      %57 = arith.subf %48, %56 : vector<8x5xf32>
      %58 = math.exp %57 : vector<8x5xf32>
      %cst_39 = arith.constant dense<0.000000e+00> : vector<8xf32>
      %59 = vector.multi_reduction <add>, %58, %cst_39 [1] : vector<8x5xf32> to vector<8xf32>
      %60 = vector.shape_cast %59 : vector<8xf32> to vector<8x1xf32>
      %61 = vector.broadcast %60 : vector<8x1xf32> to vector<8x5xf32>
      %62 = arith.divf %58, %61 : vector<8x5xf32>
      %c0_40 = arith.constant 0 : index
      %c0_41 = arith.constant 0 : index
      %63 = vector.load %arg10[%c0_40, %c0_41] : memref<5x32xf32, #tpu.memory_space<vmem>>, vector<5x32xf32>
      %cst_42 = arith.constant dense<0.000000e+00> : vector<8x32xf32>
      %64 = tpu.matmul %62, %63, %cst_42 {dimension_numbers = #tpu.dot_dimension_numbers<[1], [0], [0], [1], [0, 0, 1, 1], [], []>} : vector<8x5xf32>, vector<5x32xf32>, vector<8x32xf32> -> vector<8x32xf32>
      %c0_43 = arith.constant 0 : index
      %c0_44 = arith.constant 0 : index
      %c32 = arith.constant 32 : index
      %65 = vector.load %arg13[%c0_43, %c0_44, %c32] : memref<1x8x128xf32, #tpu.memory_space<vmem>>, vector<1x8x32xf32>
      %66 = vector.shape_cast %65 : vector<1x8x32xf32> to vector<8x32xf32>
      %67 = vector.shape_cast %64 : vector<8x32xf32> to vector<1x8x32xf32>
      tpu.vector_store %arg13[%c0_43, %c0_44, %c32], %67 {strides = array<i32>} : memref<1x8x128xf32, #tpu.memory_space<vmem>>, vector<1x8x32xf32>,
      %c0_45 = arith.constant 0 : index
      %c0_46 = arith.constant 0 : index
      %c64 = arith.constant 64 : index
      %68 = vector.load %arg13[%c0_45, %c0_46, %c64] : memref<1x8x128xf32, #tpu.memory_space<vmem>>, vector<1x8x5xf32>
      %69 = vector.shape_cast %68 : vector<1x8x5xf32> to vector<8x5xf32>
      %70 = vector.shape_cast %62 : vector<8x5xf32> to vector<1x8x5xf32>
      tpu.vector_store %arg13[%c0_45, %c0_46, %c64], %70 {strides = array<i32>} : memref<1x8x128xf32, #tpu.memory_space<vmem>>, vector<1x8x5xf32>,
      %c0_47 = arith.constant 0 : index
      %c0_48 = arith.constant 0 : index
      %c96 = arith.constant 96 : index
      %71 = vector.load %arg13[%c0_47, %c0_48, %c96] : memref<1x8x128xf32, #tpu.memory_space<vmem>>, vector<1x8x6xf32>
      %72 = vector.shape_cast %71 : vector<1x8x6xf32> to vector<8x6xf32>
      %73 = vector.shape_cast %53 : vector<8x6xf32> to vector<1x8x6xf32>
      tpu.vector_store %arg13[%c0_47, %c0_48, %c96], %73 {strides = array<i32>} : memref<1x8x128xf32, #tpu.memory_space<vmem>>, vector<1x8x6xf32>,
    } else {
    }
    return
  }
  func.func @transform_0(%arg0: i32) -> (i32, i32, i32) {
    %c0_i32 = arith.constant 0 : i32
    %c0_i32_0 = arith.constant 0 : i32
    %c0_i32_1 = arith.constant 0 : i32
    return %arg0, %c0_i32, %c0_i32_0 : i32, i32, i32
  }
  func.func @transform_1(%arg0: i32) -> (i32, i32, i32) {
    %c0_i32 = arith.constant 0 : i32
    %c0_i32_0 = arith.constant 0 : i32
    %c0_i32_1 = arith.constant 0 : i32
    return %arg0, %c0_i32, %c0_i32_0 : i32, i32, i32
  }
  func.func @transform_2(%arg0: i32) -> (i32, i32, i32, i32) {
    %c0_i32 = arith.constant 0 : i32
    %c0_i32_0 = arith.constant 0 : i32
    %c0_i32_1 = arith.constant 0 : i32
    %c0_i32_2 = arith.constant 0 : i32
    return %arg0, %c0_i32, %c0_i32_0, %c0_i32_1 : i32, i32, i32, i32
  }
  func.func @transform_3(%arg0: i32) -> (i32, i32) {
    %c0_i32 = arith.constant 0 : i32
    %c0_i32_0 = arith.constant 0 : i32
    %c0_i32_1 = arith.constant 0 : i32
    return %c0_i32, %c0_i32_0 : i32, i32
  }
  func.func @transform_4(%arg0: i32) -> (i32, i32) {
    %c0_i32 = arith.constant 0 : i32
    %c0_i32_0 = arith.constant 0 : i32
    %c0_i32_1 = arith.constant 0 : i32
    return %c0_i32, %c0_i32_0 : i32, i32
  }
  func.func @transform_5(%arg0: i32) -> (i32, i32) {
    %c0_i32 = arith.constant 0 : i32
    %c0_i32_0 = arith.constant 0 : i32
    %c0_i32_1 = arith.constant 0 : i32
    return %c0_i32, %c0_i32_0 : i32, i32
  }
  func.func @transform_6(%arg0: i32) -> (i32, i32) {
    %c0_i32 = arith.constant 0 : i32
    %c0_i32_0 = arith.constant 0 : i32
    %c0_i32_1 = arith.constant 0 : i32
    return %c0_i32, %c0_i32_0 : i32, i32
  }
  func.func @transform_7(%arg0: i32) -> (i32, i32) {
    %c0_i32 = arith.constant 0 : i32
    %c0_i32_0 = arith.constant 0 : i32
    %c0_i32_1 = arith.constant 0 : i32
    return %c0_i32, %c0_i32_0 : i32, i32
  }
  func.func @transform_8(%arg0: i32) -> (i32, i32) {
    %c0_i32 = arith.constant 0 : i32
    %c0_i32_0 = arith.constant 0 : i32
    %c0_i32_1 = arith.constant 0 : i32
    return %c0_i32, %c0_i32_0 : i32, i32
  }
  func.func @transform_9(%arg0: i32) -> (i32, i32) {
    %c0_i32 = arith.constant 0 : i32
    %c0_i32_0 = arith.constant 0 : i32
    %c0_i32_1 = arith.constant 0 : i32
    return %c0_i32, %c0_i32_0 : i32, i32
  }
  func.func @transform_10(%arg0: i32) -> (i32, i32) {
    %c0_i32 = arith.constant 0 : i32
    %c0_i32_0 = arith.constant 0 : i32
    %c0_i32_1 = arith.constant 0 : i32
    return %c0_i32, %c0_i32_0 : i32, i32
  }
  func.func @transform_11(%arg0: i32) -> (i32, i32) {
    %c0_i32 = arith.constant 0 : i32
    %c0_i32_0 = arith.constant 0 : i32
    %c0_i32_1 = arith.constant 0 : i32
    return %c0_i32, %c0_i32_0 : i32, i32
  }
  func.func @transform_12(%arg0: i32) -> (i32, i32, i32) {
    %c0_i32 = arith.constant 0 : i32
    %c0_i32_0 = arith.constant 0 : i32
    %c0_i32_1 = arith.constant 0 : i32
    return %arg0, %c0_i32, %c0_i32_0 : i32, i32, i32
  }
}

</mosaic_0001>

<bundles_post_ra>
// kernel: vae_forward.1
= control target key start
LH: loop header
LB: loop body
LE: loop exit
PB: predicated region body
PF: predicated region fallthrough
CT: control target
= control target key end

     0   :  { %s1583_s21 = smov 0   ;;  %s1739_s0 = inlined_call_operand.vmem [shape: s32[2,16,1], index: 0, kind: input, shape index: {}]   ;;  %s1740_s1 = inlined_call_operand.vmem [shape: s32[2,16,1], index: 1, kind: input, shape index: {}]   ;;  %s1741_s2 = inlined_call_operand.vmem [shape: f32[2,2,8,8], index: 2, kind: input, shape index: {}]   ;;  %s1742_s3 = inlined_call_operand.vmem [shape: f32[100,32], index: 3, kind: input, shape index: {}]   ;;  %s1743_s4 = inlined_call_operand.vmem [shape: f32[4,32], index: 4, kind: input, shape index: {}]   ;;  %s1744_s5 = inlined_call_operand.vmem [shape: f32[32,32], index: 5, kind: input, shape index: {}]   ;;  %s1745_s6 = inlined_call_operand.vmem [shape: f32[1,32], index: 6, kind: input, shape index: {}]   ;;  %s1746_s7 = inlined_call_operand.vmem [shape: f32[32,5], index: 7, kind: input, shape index: {}]   ;;  %s1747_s8 = inlined_call_operand.vmem [shape: f32[1,5], index: 8, kind: input, shape index: {}]   ;;  %s1748_s9 = inlined_call_operand.vmem [shape: f32[5,32], index: 9, kind: input, shape index: {}]   ;;  %s1749_s10 = inlined_call_operand.vmem [shape: f32[5,6], index: 10, kind: input, shape index: {}]   ;;  %s1750_s11 = inlined_call_operand.vmem [shape: f32[1,6], index: 11, kind: input, shape index: {}]   ;;  %s1751_s12 = inlined_call_operand.vmem [shape: f32[2,8,128], index: 12, kind: output, shape index: {}]  }
   0x1 LB: > { %s1589_s22 = sadd.s32 4294967295, %s1506_s21   ;;  %p1289_p0 = scmp.ge.s32.totalorder %s1506_s21, 1  ;;  %s1506_s21 = sphi %s1583_s21, %s22_s21  }
   0x2   : > { %p382_p1 = scmp.lt.s32.totalorder %s1506_s21, 3 }
   0x4   : > { %p383_p2 = pnand %p1289_p0, %p382_p1 }
   0x5   : > { %p433_p3 = scmp.lt.s32.totalorder (!%p383_p2), %s1589_s22, 1  ;;  %v482_v0 = vld [vmem:[%s1742_s3] sm:$0xff] (!%p383_p2)  ;;  %v483_v1 = vld [vmem:[%s1742_s3 + $0x8] sm:$0xff] (!%p383_p2)  ;;  %v484_v2 = vld [vmem:[%s1742_s3 + $0x10] sm:$0xff] (!%p383_p2)  ;;  %v1508_v3 = vmov (!%p383_p2), 0   ;;  %vm503_vm0 = vcmask (!%p383_p2), 1043456   ;;  %v456_v26 = vlaneseq (!%p383_p2) }
   0x6   : > { %386 = sbr.rel (%p383_p2) target bundleno = 1675 (0x68b), region = 68  ;;  %1493 = vset.pattern.permute.xlu1 (!%p383_p2), %v1508_v3  ;;  %1492 = vset.pattern.permute.xlu0 (!%p383_p2), %v1508_v3  ;;  %v1436_v4 = vpack.c.bf16 (!%p383_p2), %v483_v1, %v482_v0  ;;  %v485_v5 = vld [vmem:[%s1742_s3 + $0x18] sm:$0xff] (!%p383_p2)  ;;  %v486_v7 = vld [vmem:[%s1742_s3 + $0x20] sm:$0xff] (!%p383_p2)  ;;  %v487_v8 = vld [vmem:[%s1742_s3 + $0x28] sm:$0xff] (!%p383_p2)  ;;  %v1509_v23 = vmov (!%p383_p2), 0.0   ;;  %vm582_vm2 = vcmask (!%p383_p2), 818176  }
   0x7   : > { %v1440_v6 = vpack.c.bf16 (!%p383_p2), %v485_v5, %v484_v2  ;;  %v1444_v9 = vpack.c.bf16 (!%p383_p2), %v487_v8, %v486_v7  ;;  %v488_v11 = vld [vmem:[%s1742_s3 + $0x30] sm:$0xff] (!%p383_p2)  ;;  %v489_v12 = vld [vmem:[%s1742_s3 + $0x38] sm:$0xff] (!%p383_p2)  ;;  %v490_v17 = vld [vmem:[%s1742_s3 + $0x40] sm:$0xff] (!%p383_p2)  ;;  %v457_v27 = vand.u32 (!%p383_p2), 127, %v456_v26  ;;  %vm496_vm5 = vcmask (!%p383_p2), 31744   ;;  %p1311_p4 = scmp.ne.s32.totalorder (!%p383_p2), %s1589_s22, 0 }
   0x8   : > { %1437 = vmatprep.subr.bf16.mxu0 (!%p383_p2), %v1436_v4  ;;  %v1448_v16 = vpack.c.bf16 (!%p383_p2), %v489_v12, %v488_v11  ;;  %v491_v18 = vld [vmem:[%s1742_s3 + $0x48] sm:$0xff] (!%p383_p2)  ;;  %v495_v19 = vld [vmem:[%s1743_s4] sm:$0xf] (!%p383_p2)  ;;  %v492_v21 = vld [vmem:[%s1742_s3 + $0x50] sm:$0xff] (!%p383_p2)  ;;  %vm1510_vm7 = vmmov (!%p383_p2), 0   ;;  %vm669_vm8 = vcmask (!%p383_p2), 64512  }
   0x9   : > { %1439 = vmatpush3.bf16.msra.mxu0 (!%p383_p2), %v1436_v4  ;;  %v1452_v20 = vpack.c.bf16 (!%p383_p2), %v491_v18, %v490_v17  ;;  %1360 = vmatprep.subr.msk.mxu1 (!%p383_p2), %vm503_vm0, %v495_v19  ;;  %v493_v22 = vld [vmem:[%s1742_s3 + $0x58] sm:$0xff] (!%p383_p2)  ;;  %v494_v25 = vld [vmem:[%s1742_s3 + $0x60] sm:$0xf] (!%p383_p2)  ;;  %v1511_v60 = vmov (!%p383_p2), 0.0|0.0   ;;  %v842_v62 = vld [vmem:[%s1744_s5 + $0x8] sm:$0xff] (!%p383_p2)  ;;  %vm836_vm9 = vcmask (!%p383_p2), 1041409  }
   0xa   : > { %1441 = vmatprep.subr.bf16.mxu0 (!%p383_p2), %v1440_v6  ;;  %1361 = vmatpush3.msk.msra.mxu1 (!%p383_p2), %vm503_vm0, %v495_v19  ;;  %v1456_v24 = vpack.c.bf16 (!%p383_p2), %v493_v22, %v492_v21  ;;  %v841_v61 = vld [vmem:[%s1744_s5] sm:$0xff] (!%p383_p2)  ;;  %v843_v0 = vld [vmem:[%s1744_s5 + $0x10] sm:$0xff] (!%p383_p2)  ;;  %v844_v1 = vld [vmem:[%s1744_s5 + $0x18] sm:$0xff] (!%p383_p2)  ;;  %vm839_vm10 = vcmask (!%p383_p2), 1041408   ;;  %vm852_vm11 = vcmask (!%p383_p2), 261120  }
   0xb   : > { %1394 = vmatprep.subr.mxu1 (!%p383_p2), %v1509_v23  ;;  %v1461_v63 = vpack.c.bf16 (!%p383_p2), %v842_v62, %v841_v61  ;;  %v1464_v2 = vpack.c.bf16 (!%p383_p2), %v844_v1, %v843_v0 }
   0xd   : > { %s1607_s13 = scalar_select %p433_p3, %s1589_s22, 1  ;;  %1443 = vmatpush3.bf16.msra.mxu0 %v1440_v6 }
   0xe   : > { %1445 = vmatprep.subr.bf16.mxu0 %v1444_v9  ;;  %v934_v17 = vld [vmem:[%s1746_s7 + $0x8] sm:$0xff] (!%p1311_p4)  ;;  %v935_v18 = vld [vmem:[%s1746_s7 + $0x10] sm:$0xff] (!%p1311_p4)  ;;  %v1512_v19 = vmov (!%p1311_p4), 0.0|0.0   ;;  %v936_v21 = vld [vmem:[%s1746_s7 + $0x18] sm:$0xff] (!%p1311_p4)  ;;  %vm1513_vm12 = vmmov (!%p1311_p4), 0   ;;  %v1514_v22 = vmov (!%p1311_p4), 0.0  }
   0xf   : > { %s1616_s18 = sshll.u32 %s1607_s13, 4  ;;  %s1296_s27 = sshll.u32 %s1607_s13, 3  ;;  %vm1029_vm13 = vcmask (!%p1311_p4), 1044480   ;;  %vm1025_vm14 = vcmask (!%p1311_p4), 39936   ;;  %vm1195_vm15 = vcmask (!%p1311_p4), 523520  }
  0x10   : > { %s437_s23 = scalar_lea.vmem %s1739_s0, %s1616_s18  ;;  %s442_s26 = scalar_lea.vmem %s1740_s1, %s1616_s18 }
  0x11   : > { %v453_v10 = vld [vmem:[%s437_s23 + $0x8] sm:$0xff]  ;;  %v452_v13 = vld [vmem:[%s437_s23] sm:$0xff]  ;;  %1447 = vmatpush3.bf16.msra.mxu0 %v1444_v9  ;;  %s447_s14 = scalar_lea.vmem %s1741_s2, %s1616_s18  ;;  %s1694_s30 = scalar_lea.vmem %s1751_s12, %s1296_s27 }
  0x12   : > { %462 = vperm.xlu1 %1493, %v453_v10   ;;  %459 = vperm.xlu0 %1492, %v452_v13   ;;  %v455_v14 = vld [vmem:[%s442_s26 + $0x8] sm:$0xff]  ;;  %v454_v15 = vld [vmem:[%s442_s26] sm:$0xff]  ;;  %s1516_s18 = smov (!%p1311_p4), 32   ;;  %s1517_s15 = smov (!%p1311_p4), 64  }
  0x13   : > { %1449 = vmatprep.subr.bf16.mxu0 %v1448_v16  ;;  %v667_v36 = vld [vmem:[%s447_s14] sm:$0xff]  ;;  %v668_v38 = vld [vmem:[%s447_s14 + $0x8] sm:$0xff]  ;;  %s1515_s14 = smov (!%p1311_p4), 96  }
  0x14   : > { %v670_v37 = vsel %vm669_vm8, %v667_v36, 0.0  ;;  %v677_v40 = vsel %vm669_vm8, %v668_v38, 0.0  ;;  %v1309_v10 = vld [vmem:[%s1745_s6] ss:$0 sm:$0xff] }
  0x15   : > { %1451 = vmatpush3.bf16.msra.mxu0 %v1448_v16  ;;  %v671_v39 = vrot.slane %v670_v37, 4  ;;  %v678_v42 = vrot.slane %v677_v40, 4  ;;  %v933_v16 = vld [vmem:[%s1746_s7] sm:$0xff] (!%p1311_p4) }
  0x16   : > { %474 = vperm.xlu1 %1493, %v455_v14   ;;  %471 = vperm.xlu0 %1492, %v454_v15   ;;  %v1314_v36 = vld [vmem:[%s1750_s11] ss:$0 sm:$0xff] (!%p1311_p4) }
  0x17   : > { %1453 = vmatprep.subr.bf16.mxu0 %v1452_v20  ;;  %v672_v41 = vadd.f32 %v671_v39, %v670_v37  ;;  %v679_v44 = vadd.f32 %v678_v42, %v677_v40 }
  0x19   : > { %1455 = vmatpush3.bf16.msra.mxu0 %v1452_v20  ;;  %v673_v43 = vrot.slane %v672_v41, 2  ;;  %v680_v46 = vrot.slane %v679_v44, 2  ;;  %v1467_v20 = vpack.c.bf16 (!%p1311_p4), %v934_v17, %v933_v16 }
  0x1a   : > { %1457 = vmatprep.subr.bf16.mxu0 %v1456_v24 }
  0x1b   : > { %v674_v45 = vadd.f32 %v673_v43, %v672_v41  ;;  %v681_v48 = vadd.f32 %v680_v46, %v679_v44 }
  0x1d   : > { %1459 = vmatpush3.bf16.msra.mxu0 %v1456_v24  ;;  %v675_v47 = vrot.slane %v674_v45, 1  ;;  %v682_v52 = vrot.slane %v681_v48, 1  ;;  %v1017_v24 = vld [vmem:[%s1749_s10] sm:$0x1f] (!%p1311_p4) }
  0x1e   : > { %1389 = vmatprep.subr.msk.mxu0 %vm503_vm0, %v494_v25 }
  0x1f   : > { %v676_v51 = vadd.f32 %v675_v47, %v674_v45  ;;  %v683_v57 = vadd.f32 %v682_v52, %v681_v48 }
  0x21   : > { %1390 = vmatpush3.msk.msra.mxu0 %vm503_vm0, %v494_v25  ;;  %v685_v56 = vmul.f32 0.125, %v676_v51  ;;  %v686_v59 = vmul.f32 0.125, %v683_v57  ;;  %v1312_v25 = vld [vmem:[%s1747_s8] ss:$0 sm:$0xff] (!%p1311_p4)  ;;  %vm1200_vm0 = vcmask (!%p1311_p4), 564736  }
  0x22   : > { %1466 = vmatprep.subr.bf16.mxu0 (!%p1311_p4), %v1512_v19 }
  0x91   : > { %v463_v28 = vpop.permute.xlu1 %462  ;;  %v460_v29 = vpop.permute.xlu0 %459 }
  0x92   : > { %vm465_vm1 = vcmp.eq.s32.totalorder %v463_v28, %v457_v27  ;;  %vm464_vm3 = vcmp.eq.s32.totalorder %v460_v29, %v457_v27 }
  0x93   : > { %v1298_v30 = vsel %vm465_vm1, 1.0, %v1509_v23  ;;  %v1297_v31 = vsel %vm464_vm3, 1.0, %v1509_v23  ;;  %vm1206_vm1 = vcmask (!%p1311_p4), 835328  }
  0x94   : > { %1391 = vmatprep.mubr.msk.f32.mxu0 %vm582_vm2, %v1297_v31 }
  0x95   : > { %v475_v32 = vpop.permute.xlu1 %474  ;;  %1392 = vmatmul.mubr.msk.f32.vlgmr.msra.gmra.mrb[0].mxu0 %vm582_vm2, %v1298_v30  ;;  %v472_v33 = vpop.permute.xlu0 %471 }
  0x96   : > { %vm477_vm4 = vcmp.eq.s32.totalorder %v475_v32, %v457_v27  ;;  %vm476_vm6 = vcmp.eq.s32.totalorder %v472_v33, %v457_v27  ;;  %1423 = vmatprep.mubr.msk.f32.mxu0 (!%p1311_p4), %vm1513_vm12, %v1514_v22  ;;  %1468 = vmatpush3.bf16.msra.mxu0 (!%p1311_p4), %v1467_v20 }
  0x97   : > { %v1300_v34 = vsel %vm477_vm4, 1.0, %v1509_v23  ;;  %v1299_v35 = vsel %vm476_vm6, 1.0, %v1509_v23  ;;  %1469 = vmatprep.subr.bf16.mxu0 (!%p1311_p4), %v1512_v19 }
  0x98   : > { %1362 = vmatprep.mubr.msk.f32.mxu1 %vm496_vm5, %v1299_v35  ;;  %v1114_v35 = vld [vmem:[%s1748_s9] sm:$0x1f] (!%p1311_p4) }
  0x99   : > { %1363 = vmatmul.mubr.msk.f32.vlgmr.msra.gmra.mrb[0].mxu1 %vm496_vm5, %v1300_v34 }
  0x9a   : > { %1396 = vmatprep.mubr.msk.f32.mxu1 %vm1510_vm7, %v1509_v23 }
 0x168   : > { %v1393_v49 = vpop.f32.mrb[0].mxu0 }
 0x169   : > { %v658_v50 = vpop.f32.mrb[1].mxu0 }
 0x16c   : > { %v1364_v53 = vpop.f32.mrb[0].mxu1 }
 0x16d   : > { %v664_v54 = vadd.f32 %v1393_v49, %v1364_v53  ;;  %v573_v55 = vpop.f32.mrb[1].mxu1 }
 0x16e   : > { %v659_v58 = vadd.f32 %v658_v50, %v573_v55 }
 0x170   : > { %1395 = vmatpush3.msra.mxu1 %v659_v58 }
 0x171   : > { %1397 = vmatmul.mubr.msk.f32.vlgmr.msra.gmra.mrb[2].mxu1 %vm669_vm8, %v685_v56  ;;  %1399 = vmatprep.subr.mxu1 %v1509_v23 }
 0x172   : > { %1400 = vmatpush3.msra.mxu1 %v664_v54  ;;  %1401 = vmatprep.mubr.msk.f32.mxu1 %vm1510_vm7, %v1509_v23 }
 0x173   : > { %1460 = vmatprep.subr.bf16.mxu1 %v1511_v60 }
 0x175   : > { %1402 = vmatmul.mubr.msk.f32.vlgmr.msra.gmra.mrb[4].mxu1 %vm669_vm8, %v686_v59 }
 0x176   : > { %1412 = vmatprep.mubr.msk.f32.mxu1 %vm1510_vm7, %v1509_v23  ;;  %1462 = vmatpush3.bf16.msra.mxu1 %v1461_v63  ;;  %v1470_v23 = vpack.c.bf16 (!%p1311_p4), %v936_v21, %v935_v18 }
 0x177   : > { %1463 = vmatprep.subr.bf16.mxu1 %v1511_v60 }
 0x178   : > { %1471 = vmatpush3.bf16.msra.mxu0 (!%p1311_p4), %v1470_v23 }
 0x17a   : > { %1465 = vmatpush3.bf16.msra.mxu1 %v1464_v2 }
 0x17b   : > { %1426 = vmatprep.subr.mxu1 (!%p1311_p4), %v1514_v22 }
 0x244   : > { %v756_v3 = vpop.f32.mrb[2].mxu1 }
 0x245   : > { %v1398_v4 = vpop.f32.mrb[3].mxu1 }
 0x248   : > { %v829_v5 = vpop.f32.mrb[4].mxu1 }
 0x249   : > { %v835_v6 = vrot.slane %v829_v5, 7  ;;  %v1403_v7 = vpop.f32.mrb[5].mxu1 }
 0x24b   : > { %v837_v8 = vsel %vm836_vm9, %v835_v6, %v756_v3 }
 0x24c   : > { %v840_v9 = vsel %vm839_vm10, %v837_v8, 0.0 }
 0x24d   : > { %1413 = vmatmul.mubr.msk.f32.vlgmr.msra.gmra.mrb[6].mxu1 %vm852_vm11, %v840_v9 }
 0x24e   : > { %1428 = vmatprep.mubr.msk.f32.mxu1 (!%p1311_p4), %vm1513_vm12, %v1514_v22  ;;  %1427 = vmatpush3.msk.msra.mxu1 (!%p1311_p4), %vm1029_vm13, %v1017_v24 }
 0x24f   : > { %1431 = vmatprep.subr.mxu1 (!%p1311_p4), %v1514_v22 }
 0x320   : > { %v922_v11 = vpop.f32.mrb[6].mxu1 }
 0x321   : > { %v923_v12 = vadd.f32 %v1309_v10, %v922_v11  ;;  %v1414_v13 = vpop.f32.mrb[7].mxu1 }
 0x323   : > { %1494 = vtanh.f32 %v923_v12 }
 0x329   : > { %932 = sbr.rel (%p1311_p4) target bundleno = 1675 (0x68b), region = 72 }
 0x32d   : > { %v1495_v14 = vpop.eup %1494 }
 0x32e   : > { %v927_v15 = vsel %vm852_vm11, %v1495_v14, 0.0  ;;  %1424 = vmatmul.mubr.msk.f32.vlgmr.msra.gmra.mrb[0].mxu0 (!%p1311_p4), %vm852_vm11, %v1495_v14 }
 0x32f   : > { %928 = vst [vmem:[%s1694_s30] sm:$0xff] %v927_v15 }
 0x401   : > { %v1013_v26 = vpop.f32.mrb[0].mxu0 }
 0x402   : > { %v1014_v27 = vadd.f32 %v1312_v25, %v1013_v26  ;;  %v1425_v28 = vpop.f32.mrb[1].mxu0 }
 0x404   : > { %1429 = vmatmul.mubr.msk.f32.vlgmr.msra.gmra.mrb[0].mxu1 %vm1025_vm14, %v1014_v27  ;;  %v1103_v29 = vsel %vm1025_vm14, %v1014_v27, -inf }
 0x405   : > { %1104 = vmax.xlane.f32.xlu0 %v1103_v29  ;;  %1433 = vmatprep.mubr.msk.f32.mxu1 %vm1513_vm12, %v1514_v22 }
 0x406   : > { %1432 = vmatpush3.msk.msra.mxu1 %vm1029_vm13, %v1114_v35 }
 0x492   : > { %v1105_v30 = vpop.xlane.xlu0 %1104 }
 0x493   : > { %v1106_v31 = vsub.f32 %v1014_v27, %v1105_v30 }
 0x495   : > { %v1107_v32 = vmul.f32 1.442695, %v1106_v31 }
 0x497   : > { %1496 = vpow2.f32 %v1107_v32 }
 0x4a1   : > { %v1497_v33 = vpop.eup %1496 }
 0x4a2   : > { %v1109_v34 = vsel %vm1025_vm14, %v1497_v33, 0.0 }
 0x4a3   : > { %1110 = vadd.xlane.f32.xlu0 %v1109_v34 }
 0x4d7   : > { %v1099_v37 = vpop.f32.mrb[0].mxu1 }
 0x4d8   : > { %v1100_v38 = vadd.f32 %v1314_v36, %v1099_v37  ;;  %v1430_v39 = vpop.f32.mrb[1].mxu1 }
 0x4da   : > { %1203 = vrot.lane.b32.xlu0 %v1100_v38, %s1515_s14 }
 0x530   : > { %v1111_v40 = vpop.xlane.xlu0 %1110 }
 0x531   : > { %1498 = vrcp.f32 %v1111_v40 }
 0x53b   : > { %v1499_v41 = vpop.eup %1498 }
 0x53c   : > { %v1113_v42 = vmul.f32 %v1499_v41, %v1497_v33 }
 0x53e   : > { %1434 = vmatmul.mubr.msk.f32.vlgmr.msra.gmra.mrb[2].mxu1 %vm1025_vm14, %v1113_v42 }
 0x54c   : > { %v1204_v47 = vpop.permute.xlu0 %1203 }
 0x611   : > { %v1187_v43 = vpop.f32.mrb[2].mxu1 }
 0x612   : > { %1192 = vrot.lane.b32.xlu1 %v1187_v43, %s1516_s18  ;;  %v1435_v44 = vpop.f32.mrb[3].mxu1 }
 0x616   : > { %1197 = vrot.lane.b32.xlu1 %v1113_v42, %s1517_s15 }
 0x684   : > { %v1193_v45 = vpop.permute.xlu1 %1192 }
 0x685   : > { %1196 = vst.msk [vmem:[%s1694_s30] sm:$0xff] %vm1195_vm15, %v1193_v45 }
 0x688   : > { %v1198_v46 = vpop.permute.xlu1 %1197 }
 0x689   : > { %1201 = vst.msk [vmem:[%s1694_s30] sm:$0xff] %vm1200_vm0, %v1198_v46 }
 0x68a   : > { %1207 = vst.msk [vmem:[%s1694_s30] sm:$0xff] %vm1206_vm1, %v1204_v47 }
 0x68b PF: > { %s22_s21 = sadd.s32 1, %s1506_s21  }
 0x68c   : > { %p19_p5 = scmp.ge.s32.totalorder %s22_s21, 4  }
 0x68e   :  { %21 = sbr.rel (!%p19_p5) target bundleno = 1 (0x1), region = 108 }

</bundles_post_ra>
